<compile_context>
chip_gen: v7x
topology: tpu7x:2x2x1
jax: 0.10.0
libtpu: 0.0.40
codegen_flags: <defaults>
</compile_context>

<pallas_src>
import jax
import jax.numpy as jnp
from jax.experimental import pallas as pl
from jax.experimental.pallas import tpu as pltpu

LANE = 128        # lane width (last-dim alignment)
ROW_ALIGN = 16    # row-tile alignment (covers bf16 (16,128) packing and f32 (8,128))


# --------------------------------------------------------------------------
# Small padding / sizing helpers
# --------------------------------------------------------------------------
def _round_up(x, m):
    return ((x + m - 1) // m) * m


def _pad2(w, rows, cols):
    return jnp.pad(w, ((0, rows - w.shape[0]), (0, cols - w.shape[1])))


def _pad_rows(x, n_pad):
    if x.shape[0] == n_pad:
        return x
    pad = [(0, n_pad - x.shape[0])] + [(0, 0)] * (x.ndim - 1)
    return jnp.pad(x, pad)


def _pick_row_tile(n_rows, s, d_in, d_out, max_tile=512, budget_bytes=24 << 20):
    """Largest ROW_ALIGN-multiple row tile whose double-buffered working set fits a
    conservative VMEM budget (safe for v7x's 64 MiB part / 32 MiB scoped default)."""
    tile = _round_up(max(1, min(max_tile, n_rows)), ROW_ALIGN)

    def bytes_for(t):
        # bf16 self+neigh tiles (2 B) and out tile (<=4 B), double-buffered (x2).
        return 2 * (2 * t * d_in * (s + 1) + 4 * t * d_out)

    while tile > ROW_ALIGN and bytes_for(tile) > budget_bytes:
        tile = _round_up(tile // 2, ROW_ALIGN)
    return tile


# --------------------------------------------------------------------------
# Pallas kernels
# --------------------------------------------------------------------------
def _sage_layer_kernel(self_ref, neigh_ref, w_cat_ref, out_ref):
    # self_ref:  [nt, d_in]        bf16
    # neigh_ref: [nt, s, d_in]     bf16
    # w_cat_ref: [2*d_in, d_out]   bf16   (neigh half pre-scaled by 1/s)
    neigh_sum = jnp.sum(neigh_ref[...].astype(jnp.float32), axis=1)          # f32 accumulate
    x_cat = jnp.concatenate(
        [self_ref[...].astype(jnp.float32), neigh_sum], axis=-1).astype(jnp.bfloat16)
    h = jnp.dot(x_cat, w_cat_ref[...], preferred_element_type=jnp.float32)   # one MXU pass
    out_ref[...] = jnp.maximum(h, 0.0).astype(out_ref.dtype)                 # ReLU in f32


def _sage_final_kernel(self_ref, neigh_ref, w_cat_ref, fc_w_ref, fc_b_ref, out_ref):
    # Last aggregator layer fused with the classifier: fc(relu(agg(...))).
    neigh_sum = jnp.sum(neigh_ref[...].astype(jnp.float32), axis=1)
    x_cat = jnp.concatenate(
        [self_ref[...].astype(jnp.float32), neigh_sum], axis=-1).astype(jnp.bfloat16)
    h = jnp.maximum(
        jnp.dot(x_cat, w_cat_ref[...], preferred_element_type=jnp.float32), 0.0)
    logits = jnp.dot(h.astype(jnp.bfloat16), fc_w_ref[...],
                     preferred_element_type=jnp.float32) + fc_b_ref[...]
    out_ref[...] = logits.astype(out_ref.dtype)


# --------------------------------------------------------------------------
# pallas_call wrappers (row-tiled, parallel grid)
# --------------------------------------------------------------------------
def _aggregate_stacked(self_list, neigh_list, w_self, w_neigh, s, *, row_tile_max=512):
    """One pallas_call for all level pairs of a layer sharing the same fan-out s."""
    self_cat = self_list[0] if len(self_list) == 1 else jnp.concatenate(self_list, axis=0)
    neigh_cat = neigh_list[0] if len(neigh_list) == 1 else jnp.concatenate(neigh_list, axis=0)
    n, d_in = self_cat.shape
    d_out = _round_up(w_self.shape[1], LANE)

    # Fused weight [W_self ; W_neigh / s]: the mean's 1/s rides in the matmul for free.
    w_cat = jnp.concatenate(
        [_pad2(w_self, d_in, d_out), _pad2(w_neigh, d_in, d_out) * (1.0 / float(s))],
        axis=0).astype(jnp.bfloat16)

    nt = _pick_row_tile(n, s, d_in, d_out, max_tile=row_tile_max)
    n_pad = _round_up(n, nt)
    self_cat = _pad_rows(self_cat, n_pad)
    neigh_cat = _pad_rows(neigh_cat, n_pad)

    out = pl.pallas_call(
        _sage_layer_kernel,
        out_shape=jax.ShapeDtypeStruct((n_pad, d_out), jnp.bfloat16),
        grid=(n_pad // nt,),
        in_specs=[
            pl.BlockSpec((nt, d_in), lambda i: (i, 0)),
            pl.BlockSpec((nt, s, d_in), lambda i: (i, 0, 0)),
            pl.BlockSpec((2 * d_in, d_out), lambda i: (0, 0)),      # weight stays resident
        ],
        out_specs=pl.BlockSpec((nt, d_out), lambda i: (i, 0)),
        compiler_params=pltpu.CompilerParams(dimension_semantics=("parallel",)),
    )(self_cat, neigh_cat, w_cat)

    # Split the stacked rows back into per-pair embeddings.
    outs, off = [], 0
    for m in self_list:
        outs.append(out[off:off + m.shape[0]])
        off += m.shape[0]
    return outs


def _aggregate_final_fused(self_v, neigh_v, w_self, w_neigh, s, fc_w, fc_b,
                           num_classes, *, row_tile_max=512):
    """Last aggregator layer with the classifier fused into its epilogue."""
    n, d_in = self_v.shape
    d_out = _round_up(w_self.shape[1], LANE)
    c_pad = _round_up(num_classes, LANE)

    w_cat = jnp.concatenate(
        [_pad2(w_self, d_in, d_out), _pad2(w_neigh, d_in, d_out) * (1.0 / float(s))],
        axis=0).astype(jnp.bfloat16)
    fc_w_p = _pad2(fc_w, d_out, c_pad).astype(jnp.bfloat16)
    fc_b_p = _pad2(fc_b, 1, c_pad).astype(jnp.float32)

    nt = _pick_row_tile(n, s, d_in, max(d_out, c_pad), max_tile=row_tile_max)
    n_pad = _round_up(n, nt)
    self_p = _pad_rows(self_v, n_pad)
    neigh_p = _pad_rows(neigh_v, n_pad)

    out = pl.pallas_call(
        _sage_final_kernel,
        out_shape=jax.ShapeDtypeStruct((n_pad, c_pad), jnp.float32),
        grid=(n_pad // nt,),
        in_specs=[
            pl.BlockSpec((nt, d_in), lambda i: (i, 0)),
            pl.BlockSpec((nt, s, d_in), lambda i: (i, 0, 0)),
            pl.BlockSpec((2 * d_in, d_out), lambda i: (0, 0)),
            pl.BlockSpec((d_out, c_pad), lambda i: (0, 0)),
            pl.BlockSpec((1, c_pad), lambda i: (0, 0)),
        ],
        out_specs=pl.BlockSpec((nt, c_pad), lambda i: (i, 0)),
        compiler_params=pltpu.CompilerParams(dimension_semantics=("parallel",)),
    )(self_p, neigh_p, w_cat, fc_w_p, fc_b_p)

    return out[:n, :num_classes]


# --------------------------------------------------------------------------
# Model glue (sampling, gathers, layer loop) — plain JAX
# --------------------------------------------------------------------------
def sample_levels(batch_nodes, adjacency, num_samples_per_layer, key):
    """Mirror of supervisedGraphSAGE.sample(): multi-level uniform neighbor sampling."""
    whole = [batch_nodes]
    for ns in num_samples_per_layer:
        key, sub = jax.random.split(key)
        nodes = whole[-1]
        cols = jax.random.randint(sub, (nodes.shape[0], ns), 0, adjacency.shape[1])
        neigh = jnp.take_along_axis(adjacency[nodes], cols, axis=1)  # [n, ns]
        whole.append(neigh.reshape(-1).astype(jnp.int32))
    return whole


def graphsage_forward(batch_nodes, features, adjacency, params,
                      num_samples_per_layer, sample_key):
    whole_batch_nodes = sample_levels(batch_nodes, adjacency,
                                      num_samples_per_layer, sample_key)

    d_pad = _round_up(features.shape[1], LANE)
    feats = jnp.pad(features, ((0, 0), (0, d_pad - features.shape[1]))).astype(jnp.bfloat16)
    # TODO(synk): fuse this gather into the kernels (scalar-prefetch / manual DMA row
    #             gather) so the [n*s, d] neighbor tensor never round-trips through HBM.
    hidden = [feats[nodes] for nodes in whole_batch_nodes]

    n_layers = len(params["layers"])
    num_classes = params["fc_w"].shape[1]

    for li, layer_p in enumerate(params["layers"]):
        # Build (self, neigh[n, s, d]) level pairs for this layer.
        pairs = []
        for i in range(len(hidden) - 1):
            self_v = hidden[i]
            n_i, d_i = self_v.shape
            assert hidden[i + 1].shape[0] % n_i == 0, "ragged neighbor count"
            s_i = hidden[i + 1].shape[0] // n_i
            pairs.append((self_v, hidden[i + 1].reshape(n_i, s_i, d_i), s_i))

        if li == n_layers - 1:
            # Only hidden[0] is consumed after the last layer -> compute just pair 0
            # and fuse the classifier into the same kernel (identical output).
            self_v, neigh_v, s_i = pairs[0]
            return _aggregate_final_fused(self_v, neigh_v,
                                          layer_p["w_self"], layer_p["w_neigh"], s_i,
                                          params["fc_w"], params["fc_b"], num_classes)

        # Stack all pairs with the same fan-out into a single pallas_call per layer.
        groups = {}
        for idx, (_, _, s_i) in enumerate(pairs):
            groups.setdefault(s_i, []).append(idx)
        new_hidden = [None] * len(pairs)
        for s_i, idxs in groups.items():
            outs = _aggregate_stacked([pairs[j][0] for j in idxs],
                                      [pairs[j][1] for j in idxs],
                                      layer_p["w_self"], layer_p["w_neigh"], s_i)
            for j, o in zip(idxs, outs):
                new_hidden[j] = o
        hidden = new_hidden

    # Degenerate config with no aggregator layers: classifier on gathered features.
    emb = hidden[0][:, :params["fc_w"].shape[0]].astype(jnp.float32)
    return emb @ params["fc_w"] + params["fc_b"]


# --------------------------------------------------------------------------
# Deterministic parameter init + driver
# --------------------------------------------------------------------------
def init_params(key, feat_dim, hid_dim, classes, num_layers):
    layers = []
    dims = [feat_dim] + [hid_dim] * num_layers
    for li in range(num_layers):
        key, k1, k2 = jax.random.split(key, 3)
        layers.append({
            "w_self": 0.1 * jax.random.normal(k1, (dims[li], dims[li + 1]), jnp.float32),
            "w_neigh": 0.1 * jax.random.normal(k2, (dims[li], dims[li + 1]), jnp.float32),
        })
    key, kw, kb = jax.random.split(key, 3)
    fc_w = 0.1 * jax.random.normal(kw, (dims[-1], classes), jnp.float32)
    fc_b = 0.1 * jax.random.normal(kb, (1, classes), jnp.float32)
    return {"layers": layers, "fc_w": fc_w, "fc_b": fc_b}


if __name__ == "__main__":
    N_NODES = 64      # graph size
    FEAT = 32         # input feature dim
    HID = 32          # aggregator out_dim
    CLASSES = 8
    BATCH = 8
    MAX_DEGREE = 8
    NUM_SAMPLES = [4, 4]   # samples per GraphSAGE layer (2 layers)

    root = jax.random.PRNGKey(0)
    k_feat, k_adj, k_param, k_sample = jax.random.split(root, 4)

    features = jax.random.normal(k_feat, (N_NODES, FEAT), jnp.float32)
    adjacency = jax.random.randint(k_adj, (N_NODES, MAX_DEGREE), 0, N_NODES,
                                   dtype=jnp.int32)
    batch_nodes = jnp.arange(BATCH, dtype=jnp.int32)

    params = init_params(k_param, FEAT, HID, CLASSES, num_layers=len(NUM_SAMPLES))

    out = graphsage_forward(batch_nodes, features, adjacency, params,
                            NUM_SAMPLES, k_sample)
    out = jax.block_until_ready(out)

    assert out.shape == (BATCH, CLASSES), out.shape
    assert bool(jnp.all(jnp.isfinite(out)))
    print("KERNEL_OK")
</pallas_src>

<mosaic_0001>
module attributes {stable_mosaic.version = 11 : i64} {
  func.func @_sage_layer_kernel(%arg0: i32, %arg1: memref<48x128xbf16, #tpu.memory_space<vmem>>, %arg2: memref<48x4x128xbf16, #tpu.memory_space<vmem>>, %arg3: memref<256x128xbf16, #tpu.memory_space<vmem>>, %arg4: memref<48x128xbf16, #tpu.memory_space<vmem>>) attributes {dimension_semantics = [#tpu.dimension_semantics<parallel>], iteration_bounds = array<i64: 1>, scalar_prefetch = 0 : i64, scratch_operands = 0 : i64, tpu.core_type = #tpu.core_type<tc>, window_params = [{transform_indices = @transform_0, window_bounds = array<i64: 48, 128>}, {transform_indices = @transform_1, window_bounds = array<i64: 48, 4, 128>}, {pipeline_mode = #tpu.pipeline_mode<synchronous>, transform_indices = @transform_2, window_bounds = array<i64: 256, 128>}, {transform_indices = @transform_3, window_bounds = array<i64: 48, 128>}]} {
    %c0 = arith.constant 0 : index
    %c0_0 = arith.constant 0 : index
    %c0_1 = arith.constant 0 : index
    %0 = vector.load %arg2[%c0, %c0_0, %c0_1] : memref<48x4x128xbf16, #tpu.memory_space<vmem>>, vector<48x4x128xbf16>
    %1 = arith.extf %0 : vector<48x4x128xbf16> to vector<48x4x128xf32>
    %cst = arith.constant dense<0.000000e+00> : vector<48x128xf32>
    %2 = vector.multi_reduction <add>, %1, %cst [1] : vector<48x4x128xf32> to vector<48x128xf32>
    %c0_2 = arith.constant 0 : index
    %c0_3 = arith.constant 0 : index
    %3 = vector.load %arg1[%c0_2, %c0_3] : memref<48x128xbf16, #tpu.memory_space<vmem>>, vector<48x128xbf16>
    %4 = arith.extf %3 : vector<48x128xbf16> to vector<48x128xf32>
    %5 = tpu.concatenate %4, %2 in 1 : vector<48x128xf32>, vector<48x128xf32> -> vector<48x256xf32>
    %6 = arith.truncf %5 : vector<48x256xf32> to vector<48x256xbf16>
    %c0_4 = arith.constant 0 : index
    %c0_5 = arith.constant 0 : index
    %7 = vector.load %arg3[%c0_4, %c0_5] : memref<256x128xbf16, #tpu.memory_space<vmem>>, vector<256x128xbf16>
    %cst_6 = arith.constant dense<0.000000e+00> : vector<48x128xf32>
    %8 = tpu.matmul %6, %7, %cst_6 {dimension_numbers = #tpu.dot_dimension_numbers<[1], [0], [0], [1], [0, 0, 1, 1], [], []>} : vector<48x256xbf16>, vector<256x128xbf16>, vector<48x128xf32> -> vector<48x128xf32>
    %cst_7 = arith.constant 0.000000e+00 : f32
    %9 = vector.broadcast %cst_7 : f32 to vector<48x128xf32>
    %10 = arith.maximumf %8, %9 : vector<48x128xf32>
    %11 = arith.truncf %10 : vector<48x128xf32> to vector<48x128xbf16>
    %c0_8 = arith.constant 0 : index
    %c0_9 = arith.constant 0 : index
    %12 = vector.load %arg4[%c0_8, %c0_9] : memref<48x128xbf16, #tpu.memory_space<vmem>>, vector<48x128xbf16>
    tpu.vector_store %arg4[%c0_8, %c0_9], %11 {strides = array<i32>} : memref<48x128xbf16, #tpu.memory_space<vmem>>, vector<48x128xbf16>,
    return
  }
  func.func @transform_0(%arg0: i32) -> (i32, i32) {
    %c0_i32 = arith.constant 0 : i32
    %c0_i32_0 = arith.constant 0 : i32
    return %arg0, %c0_i32 : i32, i32
  }
  func.func @transform_1(%arg0: i32) -> (i32, i32, i32) {
    %c0_i32 = arith.constant 0 : i32
    %c0_i32_0 = arith.constant 0 : i32
    %c0_i32_1 = arith.constant 0 : i32
    return %arg0, %c0_i32, %c0_i32_0 : i32, i32, i32
  }
  func.func @transform_2(%arg0: i32) -> (i32, i32) {
    %c0_i32 = arith.constant 0 : i32
    %c0_i32_0 = arith.constant 0 : i32
    %c0_i32_1 = arith.constant 0 : i32
    return %c0_i32, %c0_i32_0 : i32, i32
  }
  func.func @transform_3(%arg0: i32) -> (i32, i32) {
    %c0_i32 = arith.constant 0 : i32
    %c0_i32_0 = arith.constant 0 : i32
    return %arg0, %c0_i32 : i32, i32
  }
}

</mosaic_0001>

<bundles_post_ra>
// kernel: tpu_custom_call.1
= control target key start
LH: loop header
LB: loop body
LE: loop exit
PB: predicated region body
PF: predicated region fallthrough
CT: control target
= control target key end

     0   :  { %8 = vsyncpa [#allocation3], 0  ;;  %s1410_s0 = inlined_call_operand.hbm [shape: bf16[48,128], index: 0, kind: input, shape index: {}]   ;;  %s1411_s1 = inlined_call_operand.hbm [shape: bf16[48,4,128], index: 1, kind: input, shape index: {}]   ;;  %s1412_s2 = inlined_call_operand.hbm [shape: bf16[256,128], index: 2, kind: input, shape index: {}]   ;;  %s1413_s3 = inlined_call_operand.hbm [shape: bf16[48,128], index: 3, kind: output, shape index: {}]  }
   0x1   :  { %9 = vsyncpa [#allocation6], 0 }
   0x2   :  { %10 = vsyncpa [#allocation4], 0  ;;  %s1069_s12 = smov [#allocation5]   ;;  %s975_s16 = scalar_lea.hbm %s1411_s1, 1536 }
   0x3   :  { %s28_s13 = sshll.u32 %s1069_s12, 4  ;;  %p976_p0 = scmp.ne.s32.totalorder %s1411_s1, %s975_s16  ;;  %s29_s13 = int_to_ptr.vmem [resolvable:$true] %s28_s13 }
   0x4   :  { %p979_p1 = scmp.lt.u32.totalorder %s975_s16, %s1411_s1 }
   0x6   :  { %p981_p2 = pnand %p979_p1, %p976_p0 }
   0x8   :  { %984 = shalt.err (!%p981_p2)
}
   0x9   :  { %s985_s21 = scalar_lea.vmem %s29_s13, 1536  ;;  %p990_p4 = scmp.lt.s32.totalorder %s29_s13, %s29_s13 }
   0xa   :  { %p986_p3 = scmp.ne.s32.totalorder %s29_s13, %s985_s21  ;;  %p991_p5 = scmp.lt.s32.totalorder %s985_s21, %s985_s21 }
   0xc   :  { %p992_p6 = por %p991_p5, %p990_p4 }
   0xe   :  { %p993_p7 = pnand %p992_p6, %p986_p3 }
  0x10   :  { %996 = shalt.err (!%p993_p7)
}
  0x11   :  { %s1070_s22 = smov 32   ;;  %s1071_s23 = smov 2  }
  0x12   :  { %34 = dma.hbm_to_vmem [thread:$0]  %s1411_s1, 1536, %s29_s13, [#allocation6], %s1070_s22, %s1070_s22, %s1071_s23  }
  0x13   :  { %s1072_s26 = smov [#allocation2]   ;;  %s997_s30 = scalar_lea.hbm %s1410_s0, 384 }
  0x14   :  { %s16_s27 = sshll.u32 %s1072_s26, 4  ;;  %p998_p8 = scmp.ne.s32.totalorder %s1410_s0, %s997_s30  ;;  %s17_s27 = int_to_ptr.vmem [resolvable:$true] %s16_s27 }
  0x15   :  { %p1001_p9 = scmp.lt.u32.totalorder %s997_s30, %s1410_s0 }
  0x17   :  { %p1003_p10 = pnand %p1001_p9, %p998_p8 }
  0x19   :  { %1006 = shalt.err (!%p1003_p10)
}
  0x1a   :  { %s1007_s8 = scalar_lea.vmem %s17_s27, 384  ;;  %p1012_p12 = scmp.lt.s32.totalorder %s17_s27, %s17_s27 }
  0x1b   :  { %p1008_p11 = scmp.ne.s32.totalorder %s17_s27, %s1007_s8  ;;  %p1013_p13 = scmp.lt.s32.totalorder %s1007_s8, %s1007_s8 }
  0x1d   :  { %p1014_p0 = por %p1013_p13, %p1012_p12 }
  0x1f   :  { %p1015_p1 = pnand %p1014_p0, %p1008_p11 }
  0x21   :  { %1018 = shalt.err (!%p1015_p1)
}
  0x22   :  { %s1073_s1 = smov 64   ;;  %s1074_s9 = smov 4  }
  0x23   :  { %22 = dma.hbm_to_vmem [thread:$0]  %s1410_s0, 384, %s17_s27, [#allocation3], %s1073_s1, %s1073_s1, %s1074_s9  }
  0x24   :  { %s1075_s12 = smov [#allocation7]   ;;  %s1019_s16 = scalar_lea.hbm %s1412_s2, 2048 }
  0x25   :  { %s40_s13 = sshll.u32 %s1075_s12, 4  ;;  %p1020_p2 = scmp.ne.s32.totalorder %s1412_s2, %s1019_s16  ;;  %s41_s13 = int_to_ptr.vmem [resolvable:$true] %s40_s13 }
  0x26   :  { %p1023_p3 = scmp.lt.u32.totalorder %s1019_s16, %s1412_s2 }
  0x28   :  { %p1025_p4 = pnand %p1023_p3, %p1020_p2 }
  0x2a   :  { %1028 = shalt.err (!%p1025_p4)
}
  0x2b   :  { %s1029_s21 = scalar_lea.vmem %s41_s13, 2048  ;;  %p1034_p6 = scmp.lt.s32.totalorder %s41_s13, %s41_s13 }
  0x2c   :  { %p1030_p5 = scmp.ne.s32.totalorder %s41_s13, %s1029_s21  ;;  %p1035_p7 = scmp.lt.s32.totalorder %s1029_s21, %s1029_s21 }
  0x2e   :  { %p1036_p8 = por %p1035_p7, %p1034_p6 }
  0x30   :  { %p1037_p9 = pnand %p1036_p8, %p1030_p5 }
  0x32   :  { %1040 = shalt.err (!%p1037_p9)
}
  0x33   :  { %46 = dma.hbm_to_vmem [thread:$0]  %s1412_s2, 2048, %s41_s13, [#allocation6], %s1073_s1, %s1073_s1, %s1074_s9  }
  0x34   :  { %1063 = dma.done.wait [#allocation3], 384  }
  0x35   :  { %1064 = vsyncadd [#allocation3], 4294966912 }
  0x36   :  { %1065 = dma.done.wait [#allocation6], 3584  }
  0x37   :  { %1066 = vsyncadd [#allocation6], 4294963712  ;;  %v956_v0 = vld [vmem:[#allocation7 + $0x40] sm:$0xff]   ;;  %v958_v2 = vld [vmem:[#allocation7 + $0x48] sm:$0xff]   ;;  %vm153_vm0 = vcmask 1043456   ;;  %vm550_vm1 = vcmask 1041409  }
  0x38   :  { %v957_v1 = vld [vmem:[#allocation7] sm:$0xff]   ;;  %932 = vmatprep.subr.bf16.mxu1 %v956_v0  ;;  %898 = vmatprep.subr.bf16.mxu0 %v956_v0  ;;  %v959_v3 = vld [vmem:[#allocation7 + $0x8] sm:$0xff]   ;;  %v960_v4 = vld [vmem:[#allocation7 + $0x50] sm:$0xff]   ;;  %vm552_vm2 = vcmask 1042434   ;;  %vm554_vm3 = vcmask 1043459   ;;  %vm556_vm4 = vcmask 1044484  }
  0x39   :  { %940 = vmatpush3.bf16.msra.mxu1 %v957_v1  ;;  %899 = vmatpush3.bf16.msra.mxu0 %v957_v1  ;;  %v961_v5 = vld [vmem:[#allocation7 + $0x10] sm:$0xff]   ;;  %v962_v6 = vld [vmem:[#allocation7 + $0x58] sm:$0xff]   ;;  %v964_v8 = vld [vmem:[#allocation7 + $0x60] sm:$0xff]   ;;  %vm558_vm5 = vcmask 1045509   ;;  %vm560_vm6 = vcmask 1046534   ;;  %vm562_vm7 = vcmask 1047559  }
  0x3a   :  { %933 = vmatprep.subr.bf16.mxu1 %v958_v2  ;;  %900 = vmatprep.subr.bf16.mxu0 %v958_v2  ;;  %v963_v7 = vld [vmem:[#allocation7 + $0x18] sm:$0xff]   ;;  %v965_v9 = vld [vmem:[#allocation7 + $0x20] sm:$0xff]   ;;  %v966_v10 = vld [vmem:[#allocation7 + $0x68] sm:$0xff]   ;;  %s1076_s2 = smov [#allocation8]  }
  0x3b   :  { %v73_v11 = vld [vmem:[#allocation5 + $0x20] sm:$0x3]  ;;  %v74_v12 = vld [vmem:[#allocation5 + $0x22] sm:$0x3]  ;;  %v75_v13 = vld [vmem:[#allocation5 + $0x24] sm:$0x3] }
  0x3c   :  { %v967_v14 = vld [vmem:[#allocation7 + $0x28] sm:$0xff]   ;;  %v76_v15 = vld [vmem:[#allocation5 + $0x26] sm:$0x3]  ;;  %v121_v18 = vunpack.c.l.bf16 %v73_v11  ;;  %v968_v19 = vld [vmem:[#allocation7 + $0x70] sm:$0xff]   ;;  %v122_v23 = vunpack.c.l.bf16 %v74_v12  ;;  %v123_v24 = vunpack.c.l.bf16 %v75_v13  ;;  %s837_s23 = sshll.u32 %s1076_s2, 4  ;;  %s838_s23 = int_to_ptr.vmem [resolvable:$true] %s837_s23 }
  0x3d   :  { %941 = vmatpush3.bf16.msra.mxu1 %v959_v3  ;;  %901 = vmatpush3.bf16.msra.mxu0 %v959_v3  ;;  %v77_v16 = vld [vmem:[#allocation5 + $0x28] sm:$0x3]  ;;  %v78_v17 = vld [vmem:[#allocation5 + $0x2a] sm:$0x3]  ;;  %v79_v20 = vld [vmem:[#allocation5 + $0x2c] sm:$0x3]  ;;  %v124_v25 = vunpack.c.l.bf16 %v76_v15  ;;  %p1046_p11 = scmp.lt.s32.totalorder %s838_s23, %s838_s23 }
  0x3e   :  { %934 = vmatprep.subr.bf16.mxu1 %v960_v4  ;;  %902 = vmatprep.subr.bf16.mxu0 %v960_v4  ;;  %v80_v21 = vld [vmem:[#allocation5 + $0x2e] sm:$0x3]  ;;  %v1139_v22 = vld [vmem:[#allocation5 + $0x30] sm:$0x3]  ;;  %v1141_v26 = vld [vmem:[#allocation5 + $0x32] sm:$0x3]  ;;  %v125_v29 = vunpack.c.l.bf16 %v77_v16  ;;  %v126_v30 = vunpack.c.l.bf16 %v78_v17  ;;  %v127_v31 = vunpack.c.l.bf16 %v79_v20 }
  0x3f   :  { %v1143_v27 = vld [vmem:[#allocation5 + $0x34] sm:$0x3]  ;;  %v1145_v28 = vld [vmem:[#allocation5 + $0x36] sm:$0x3]  ;;  %v128_v32 = vunpack.c.l.bf16 %v80_v21  ;;  %v1147_v33 = vld [vmem:[#allocation5 + $0x38] sm:$0x3]  ;;  %v129_v36 = vunpack.c.l.bf16 %v1139_v22  ;;  %v130_v37 = vunpack.c.l.bf16 %v1141_v26 }
  0x40   :  { %v1149_v34 = vld [vmem:[#allocation5 + $0x3a] sm:$0x3]  ;;  %v1151_v35 = vld [vmem:[#allocation5 + $0x3c] sm:$0x3]  ;;  %v131_v38 = vunpack.c.l.bf16 %v1143_v27  ;;  %v132_v39 = vunpack.c.l.bf16 %v1145_v28  ;;  %v1157_v40 = vld [vmem:[#allocation5 + $0x3e] sm:$0x3]  ;;  %v133_v41 = vunpack.c.l.bf16 %v1147_v33 }
  0x41   :  { %942 = vmatpush3.bf16.msra.mxu1 %v961_v5  ;;  %903 = vmatpush3.bf16.msra.mxu0 %v961_v5  ;;  %v134_v42 = vunpack.c.l.bf16 %v1149_v34  ;;  %v135_v43 = vunpack.c.l.bf16 %v1151_v35  ;;  %v266_v44 = vsel %vm153_vm0, %v121_v18, 0.0  ;;  %v136_v45 = vunpack.c.l.bf16 %v1157_v40  ;;  %v969_v49 = vld [vmem:[#allocation7 + $0x30] sm:$0xff]   ;;  %v970_v54 = vld [vmem:[#allocation7 + $0x78] sm:$0xff]   ;;  %s1041_s24 = scalar_lea.vmem %s838_s23, 384 }
  0x42   :  { %935 = vmatprep.subr.bf16.mxu1 %v962_v6  ;;  %904 = vmatprep.subr.bf16.mxu0 %v962_v6  ;;  %v267_v46 = vrot.slane %v266_v44, 4  ;;  %v273_v47 = vsel %vm153_vm0, %v122_v23, 0.0  ;;  %v280_v48 = vsel %vm153_vm0, %v123_v24, 0.0  ;;  %v287_v52 = vsel %vm153_vm0, %v124_v25, 0.0  ;;  %v971_v3 = vld [vmem:[#allocation7 + $0x38] sm:$0xff]   ;;  %p1042_p10 = scmp.ne.s32.totalorder %s838_s23, %s1041_s24  ;;  %p1047_p12 = scmp.lt.s32.totalorder %s1041_s24, %s1041_s24 }
  0x43   :  { %v274_v50 = vrot.slane %v273_v47, 4  ;;  %v281_v51 = vrot.slane %v280_v48, 4  ;;  %v294_v53 = vsel %vm153_vm0, %v125_v29, 0.0  ;;  %v288_v56 = vrot.slane %v287_v52, 4 }
  0x44   :  { %v268_v55 = vadd.f32 %v267_v46, %v266_v44  ;;  %v295_v57 = vrot.slane %v294_v53, 4  ;;  %v301_v58 = vsel %vm153_vm0, %v126_v30, 0.0  ;;  %v308_v62 = vsel %vm153_vm0, %v127_v31, 0.0  ;;  %p1048_p13 = por %p1047_p12, %p1046_p11 }
  0x45   :  { %943 = vmatpush3.bf16.msra.mxu1 %v963_v7  ;;  %905 = vmatpush3.bf16.msra.mxu0 %v963_v7  ;;  %v275_v59 = vadd.f32 %v274_v50, %v273_v47  ;;  %v282_v60 = vadd.f32 %v281_v51, %v280_v48  ;;  %v302_v61 = vrot.slane %v301_v58, 4  ;;  %v289_v0 = vadd.f32 %v288_v56, %v287_v52 }
  0x46   :  { %936 = vmatprep.subr.bf16.mxu1 %v964_v8  ;;  %906 = vmatprep.subr.bf16.mxu0 %v964_v8  ;;  %v269_v63 = vrot.slane %v268_v55, 2  ;;  %v296_v1 = vadd.f32 %v295_v57, %v294_v53  ;;  %v309_v2 = vrot.slane %v308_v62, 4  ;;  %v315_v7 = vsel %vm153_vm0, %v128_v32, 0.0  ;;  %p1049_p0 = pnand %p1048_p13, %p1042_p10 }
  0x47   :  { %v276_v4 = vrot.slane %v275_v59, 2  ;;  %v283_v5 = vrot.slane %v282_v60, 2  ;;  %v303_v6 = vadd.f32 %v302_v61, %v301_v58  ;;  %v316_v15 = vrot.slane %v315_v7, 4 }
  0x48   :  { %v270_v8 = vadd.f32 %v269_v63, %v268_v55  ;;  %v310_v11 = vadd.f32 %v309_v2, %v308_v62  ;;  %v322_v51 = vsel %vm153_vm0, %v129_v36, 0.0  ;;  %v329_v55 = vsel %vm153_vm0, %v130_v37, 0.0 }
  0x49   :  { %944 = vmatpush3.bf16.msra.mxu1 %v965_v9  ;;  %907 = vmatpush3.bf16.msra.mxu0 %v965_v9  ;;  %v290_v9 = vrot.slane %v289_v0, 2  ;;  %v277_v12 = vadd.f32 %v276_v4, %v275_v59  ;;  %v284_v13 = vadd.f32 %v283_v5, %v282_v60  ;;  %v317_v24 = vadd.f32 %v316_v15, %v315_v7 }
  0x4a   :  { %937 = vmatprep.subr.bf16.mxu1 %v966_v10  ;;  %908 = vmatprep.subr.bf16.mxu0 %v966_v10  ;;  %v297_v10 = vrot.slane %v296_v1, 2  ;;  %v271_v16 = vrot.slane %v270_v8, 1  ;;  %v330_v57 = vrot.slane %v329_v55, 4  ;;  %v336_v58 = vsel %vm153_vm0, %v131_v38, 0.0 }
  0x4b   :  { %v291_v17 = vadd.f32 %v290_v9, %v289_v0  ;;  %v278_v20 = vrot.slane %v277_v12, 1  ;;  %v285_v21 = vrot.slane %v284_v13, 1  ;;  %v318_v47 = vrot.slane %v317_v24, 2 }
  0x4c   :  { %v298_v18 = vadd.f32 %v297_v10, %v296_v1  ;;  %v1171_v25 = vadd.f32 %v271_v16, %v270_v8  ;;  %v343_v22 = vsel %vm153_vm0, %v132_v39, 0.0  ;;  %v337_v60 = vrot.slane %v336_v58, 4 }
  0x4d   :  { %945 = vmatpush3.bf16.msra.mxu1 %v967_v14  ;;  %909 = vmatpush3.bf16.msra.mxu0 %v967_v14  ;;  %v304_v14 = vrot.slane %v303_v6, 2  ;;  %v292_v29 = vrot.slane %v291_v17, 1  ;;  %v1173_v32 = vadd.f32 %v278_v20, %v277_v12  ;;  %v1175_v44 = vadd.f32 %v285_v21, %v284_v13  ;;  %v57_v20 = vld [vmem:[#allocation5] sm:$0x3] }
  0x4e   :  { %938 = vmatprep.subr.bf16.mxu1 %v968_v19  ;;  %910 = vmatprep.subr.bf16.mxu0 %v968_v19  ;;  %v311_v19 = vrot.slane %v310_v11, 2  ;;  %v299_v30 = vrot.slane %v298_v18, 1  ;;  %v319_v53 = vadd.f32 %v318_v47, %v317_v24  ;;  %v344_v61 = vrot.slane %v343_v22, 4 }
  0x4f   :  { %v305_v23 = vadd.f32 %v304_v14, %v303_v6  ;;  %v1177_v48 = vadd.f32 %v292_v29, %v291_v17  ;;  %v331_v26 = vadd.f32 %v330_v57, %v329_v55  ;;  %v350_v37 = vsel %vm153_vm0, %v133_v41, 0.0  ;;  %v59_v55 = vld [vmem:[#allocation5 + $0x4] sm:$0x3]  ;;  %v60_v57 = vld [vmem:[#allocation5 + $0x6] sm:$0x3] }
  0x50   :  { %v312_v31 = vadd.f32 %v311_v19, %v310_v11  ;;  %v320_v36 = vrot.slane %v319_v53, 1  ;;  %v357_v27 = vsel %vm153_vm0, %v134_v42, 0.0  ;;  %v364_v28 = vsel %vm153_vm0, %v135_v43, 0.0 }
  0x51   :  { %946 = vmatpush3.bf16.msra.mxu1 %v969_v49  ;;  %911 = vmatpush3.bf16.msra.mxu0 %v969_v49  ;;  %v306_v46 = vrot.slane %v305_v23, 1  ;;  %v1179_v49 = vadd.f32 %v299_v30, %v298_v18  ;;  %v338_v62 = vadd.f32 %v337_v60, %v336_v58  ;;  %v345_v63 = vadd.f32 %v344_v61, %v343_v22  ;;  %v62_v60 = vld [vmem:[#allocation5 + $0xa] sm:$0x3] }
  0x52   :  { %939 = vmatprep.subr.bf16.mxu1 %v970_v54  ;;  %912 = vmatprep.subr.bf16.mxu0 %v970_v54  ;;  %v313_v50 = vrot.slane %v312_v31, 1  ;;  %v323_v54 = vrot.slane %v322_v51, 4  ;;  %v1206_v38 = vadd.f32 %v320_v36, %v319_v53  ;;  %v332_v0 = vrot.slane %v331_v26, 2 }
  0x53   :  { %v1184_v52 = vadd.f32 %v306_v46, %v305_v23  ;;  %v351_v1 = vrot.slane %v350_v37, 4  ;;  %v358_v33 = vrot.slane %v357_v27, 4  ;;  %v365_v2 = vrot.slane %v364_v28, 4 }
  0x54   :  { %v1189_v56 = vadd.f32 %v313_v50, %v312_v31  ;;  %v324_v59 = vadd.f32 %v323_v54, %v322_v51  ;;  %v339_v34 = vrot.slane %v338_v62, 2  ;;  %v371_v35 = vsel %vm153_vm0, %v136_v45, 0.0  ;;  %v58_v50 = vld [vmem:[#allocation5 + $0x2] sm:$0x3] }
  0x55   :  { %947 = vmatpush3.bf16.msra.mxu1 %v971_v3  ;;  %913 = vmatpush3.bf16.msra.mxu0 %v971_v3  ;;  %v346_v3 = vrot.slane %v345_v63, 2  ;;  %v333_v42 = vadd.f32 %v332_v0, %v331_v26  ;;  %v352_v43 = vadd.f32 %v351_v1, %v350_v37  ;;  %v359_v4 = vadd.f32 %v358_v33, %v357_v27  ;;  %v64_v37 = vld [vmem:[#allocation5 + $0xe] sm:$0x3] }
  0x56   :  { %v325_v39 = vrot.slane %v324_v59, 2  ;;  %v366_v5 = vadd.f32 %v365_v2, %v364_v28  ;;  %v340_v7 = vadd.f32 %v339_v34, %v338_v62  ;;  %v372_v9 = vrot.slane %v371_v35, 4  ;;  %v1227_v62 = vld [vmem:[#allocation5 + $0x10] sm:$0x3]  ;;  %v1238_v34 = vld [vmem:[#allocation5 + $0x18] sm:$0x3] }
  0x57   :  { %v347_v8 = vadd.f32 %v346_v3, %v345_v63  ;;  %v334_v10 = vrot.slane %v333_v42, 1  ;;  %v353_v11 = vrot.slane %v352_v43, 2  ;;  %v360_v12 = vrot.slane %v359_v4, 2  ;;  %v1229_v63 = vld [vmem:[#allocation5 + $0x12] sm:$0x3] }
  0x58   :  { %v326_v41 = vadd.f32 %v325_v39, %v324_v59  ;;  %v367_v13 = vrot.slane %v366_v5, 2  ;;  %v341_v15 = vrot.slane %v340_v7, 1  ;;  %v373_v40 = vadd.f32 %v372_v9, %v371_v35 }
  0x59   :  { %v348_v16 = vrot.slane %v347_v8, 1  ;;  %v335_v17 = vadd.f32 %v334_v10, %v333_v42  ;;  %v354_v45 = vadd.f32 %v353_v11, %v352_v43  ;;  %v361_v18 = vadd.f32 %v360_v12, %v359_v4  ;;  %v1243_v42 = vld [vmem:[#allocation5 + $0x1c] sm:$0x3]  ;;  %v1245_v43 = vld [vmem:[#allocation5 + $0x1e] sm:$0x3]  ;;  %v972_v11 = vld [vmem:[#allocation2 + $0x8] sm:$0xff]  }
  0x5a   :  { %v327_v6 = vrot.slane %v326_v41, 1  ;;  %v368_v19 = vadd.f32 %v367_v13, %v366_v5  ;;  %v342_v21 = vadd.f32 %v341_v15, %v340_v7  ;;  %v374_v24 = vrot.slane %v373_v40, 2 }
  0x5b   :  { %v349_v23 = vadd.f32 %v348_v16, %v347_v8  ;;  %v571_v29 = vsel %vm550_vm1, %v1173_v32, %v1171_v25  ;;  %v355_v30 = vrot.slane %v354_v45, 1  ;;  %v362_v31 = vrot.slane %v361_v18, 1  ;;  %v61_v32 = vld [vmem:[#allocation5 + $0x8] sm:$0x3] }
  0x5c   :  { %v328_v14 = vadd.f32 %v327_v6, %v326_v41  ;;  %v369_v46 = vrot.slane %v368_v19, 1  ;;  %v572_v47 = vsel %vm552_vm2, %v1175_v44, %v571_v29  ;;  %v375_v51 = vadd.f32 %v374_v24, %v373_v40  ;;  %v1236_v41 = vld [vmem:[#allocation5 + $0x16] sm:$0x3] }
  0x5d   :  { %v573_v53 = vsel %vm554_vm3, %v1177_v48, %v572_v47  ;;  %v105_v58 = vunpack.c.l.bf16 %v57_v20  ;;  %v356_v22 = vadd.f32 %v355_v30, %v354_v45  ;;  %v363_v36 = vadd.f32 %v362_v31, %v361_v18  ;;  %v63_v48 = vld [vmem:[#allocation5 + $0xc] sm:$0x3] }
  0x5e   :  { %v578_v54 = vsel %vm550_vm1, %v335_v17, %v328_v14  ;;  %v370_v59 = vadd.f32 %v369_v46, %v368_v19  ;;  %v574_v25 = vsel %vm556_vm4, %v1179_v49, %v573_v53  ;;  %v376_v61 = vrot.slane %v375_v51, 1  ;;  %v1231_v49 = vld [vmem:[#allocation5 + $0x14] sm:$0x3] }
  0x5f   :  { %v575_v44 = vsel %vm558_vm5, %v1184_v52, %v574_v25  ;;  %v579_v26 = vsel %vm552_vm2, %v342_v21, %v578_v54  ;;  %v106_v27 = vunpack.c.l.bf16 %v58_v50  ;;  %v107_v0 = vunpack.c.l.bf16 %v59_v55 }
  0x60   :  { %v576_v28 = vsel %vm560_vm6, %v1189_v56, %v575_v44  ;;  %v580_v39 = vsel %vm554_vm3, %v349_v23, %v579_v26  ;;  %v108_v1 = vunpack.c.l.bf16 %v60_v57  ;;  %v377_v33 = vadd.f32 %v376_v61, %v375_v51  ;;  %v1240_v56 = vld [vmem:[#allocation5 + $0x1a] sm:$0x3] }
  0x61   :  { %v577_v52 = vsel %vm562_vm7, %v1206_v38, %v576_v28  ;;  %v581_v2 = vsel %vm556_vm4, %v356_v22, %v580_v39  ;;  %v109_v3 = vunpack.c.l.bf16 %v61_v32  ;;  %v110_v4 = vunpack.c.l.bf16 %v62_v60 }
  0x62   :  { %v582_v35 = vsel %vm558_vm5, %v363_v36, %v581_v2  ;;  %v111_v5 = vunpack.c.l.bf16 %v63_v48  ;;  %v112_v6 = vunpack.c.l.bf16 %v64_v37  ;;  %v113_v7 = vunpack.c.l.bf16 %v1227_v62 }
  0x63   :  { %v583_v38 = vsel %vm560_vm6, %v370_v59, %v582_v35  ;;  %v114_v8 = vunpack.c.l.bf16 %v1229_v63  ;;  %v115_v9 = vunpack.c.l.bf16 %v1231_v49  ;;  %v116_v12 = vunpack.c.l.bf16 %v1236_v41 }
  0x64   :  { %v584_v10 = vsel %vm562_vm7, %v377_v33, %v583_v38  ;;  %v117_v13 = vunpack.c.l.bf16 %v1238_v34  ;;  %v118_v14 = vunpack.c.l.bf16 %v1240_v56  ;;  %v119_v16 = vunpack.c.l.bf16 %v1243_v42 }
  0x65   :  { %v608_v15 = vpack.c.bf16 %v584_v10, %v577_v52  ;;  %v120_v40 = vunpack.c.l.bf16 %v1245_v43  ;;  %v154_v17 = vsel %vm153_vm0, %v105_v58, 0.0  ;;  %v161_v18 = vsel %vm153_vm0, %v106_v27, 0.0 }
  0x66   :  { %v155_v45 = vrot.slane %v154_v17, 4  ;;  %v168_v19 = vsel %vm153_vm0, %v107_v0, 0.0  ;;  %v175_v20 = vsel %vm153_vm0, %v108_v1, 0.0  ;;  %v162_v21 = vrot.slane %v161_v18, 4 }
  0x67   :  { %779 = vmatprep.mubr.bf16.mxu1 %v608_v15  ;;  %v169_v23 = vrot.slane %v168_v19, 4  ;;  %v176_v24 = vrot.slane %v175_v20, 4  ;;  %v182_v29 = vsel %vm153_vm0, %v109_v3, 0.0  ;;  %v189_v46 = vsel %vm153_vm0, %v110_v4, 0.0 }
  0x68   :  { %780 = vmatmul.mubr.bf16.vlgmr.msra.gmra.mrb[0].mxu1 %v972_v11  ;;  %v156_v30 = vadd.f32 %v155_v45, %v154_v17  ;;  %v183_v31 = vrot.slane %v182_v29, 4  ;;  %v196_v47 = vsel %vm153_vm0, %v111_v5, 0.0  ;;  %v163_v50 = vadd.f32 %v162_v21, %v161_v18 }
  0x69   :  { %v170_v51 = vadd.f32 %v169_v23, %v168_v19  ;;  %v177_v53 = vadd.f32 %v176_v24, %v175_v20  ;;  %v190_v54 = vrot.slane %v189_v46, 4  ;;  %v197_v58 = vrot.slane %v196_v47, 4 }
  0x6a   :  { %v157_v55 = vrot.slane %v156_v30, 2  ;;  %v184_v57 = vadd.f32 %v183_v31, %v182_v29  ;;  %v203_v22 = vsel %vm153_vm0, %v112_v6, 0.0  ;;  %v164_v36 = vrot.slane %v163_v50, 2 }
  0x6b   :  { %v171_v59 = vrot.slane %v170_v51, 2  ;;  %v178_v25 = vrot.slane %v177_v53, 2  ;;  %v191_v32 = vadd.f32 %v190_v54, %v189_v46  ;;  %v198_v44 = vadd.f32 %v197_v58, %v196_v47 }
  0x6c   :  { %v158_v60 = vadd.f32 %v157_v55, %v156_v30  ;;  %v185_v61 = vrot.slane %v184_v57, 2  ;;  %v204_v26 = vrot.slane %v203_v22, 4  ;;  %v165_v48 = vadd.f32 %v164_v36, %v163_v50 }
  0x6d   :  { %v172_v37 = vadd.f32 %v171_v59, %v170_v51  ;;  %v179_v27 = vadd.f32 %v178_v25, %v177_v53  ;;  %v192_v28 = vrot.slane %v191_v32, 2  ;;  %v199_v1 = vrot.slane %v198_v44, 2 }
  0x6e   :  { %v159_v39 = vrot.slane %v158_v60, 1  ;;  %v186_v0 = vadd.f32 %v185_v61, %v184_v57  ;;  %v205_v33 = vadd.f32 %v204_v26, %v203_v22  ;;  %v166_v52 = vrot.slane %v165_v48, 1 }
  0x6f   :  { %v173_v2 = vrot.slane %v172_v37, 1  ;;  %v180_v3 = vrot.slane %v179_v27, 1  ;;  %v193_v35 = vadd.f32 %v192_v28, %v191_v32  ;;  %v200_v6 = vadd.f32 %v199_v1, %v198_v44 }
  0x70   :  { %v1265_v4 = vadd.f32 %v159_v39, %v158_v60  ;;  %v187_v5 = vrot.slane %v186_v0, 1  ;;  %v206_v38 = vrot.slane %v205_v33, 2  ;;  %v167_v10 = vadd.f32 %v166_v52, %v165_v48 }
  0x71   :  { %v174_v11 = vadd.f32 %v173_v2, %v172_v37  ;;  %v1267_v15 = vadd.f32 %v180_v3, %v179_v27  ;;  %v194_v17 = vrot.slane %v193_v35, 1  ;;  %v201_v18 = vrot.slane %v200_v6, 1 }
  0x72   :  { %v1269_v45 = vadd.f32 %v187_v5, %v186_v0  ;;  %v207_v19 = vadd.f32 %v206_v38, %v205_v33  ;;  %v210_v20 = vsel %vm153_vm0, %v113_v7, 0.0  ;;  %v217_v24 = vsel %vm153_vm0, %v114_v8, 0.0 }
  0x73   :  { %v1274_v21 = vadd.f32 %v194_v17, %v193_v35  ;;  %v211_v23 = vrot.slane %v210_v20, 4  ;;  %v224_v29 = vsel %vm153_vm0, %v115_v9, 0.0  ;;  %v1282_v30 = vadd.f32 %v201_v18, %v200_v6 }
  0x74   :  { %v208_v31 = vrot.slane %v207_v19, 1  ;;  %v218_v46 = vrot.slane %v217_v24, 4  ;;  %v225_v47 = vrot.slane %v224_v29, 4  ;;  %v231_v62 = vsel %vm153_vm0, %v116_v12, 0.0 }
  0x75   :  { %v212_v50 = vadd.f32 %v211_v23, %v210_v20  ;;  %v238_v63 = vsel %vm153_vm0, %v117_v13, 0.0  ;;  %v245_v49 = vsel %vm153_vm0, %v118_v14, 0.0  ;;  %v232_v51 = vrot.slane %v231_v62, 4 }
  0x76   :  { %v1293_v7 = vadd.f32 %v208_v31, %v207_v19  ;;  %v219_v8 = vadd.f32 %v218_v46, %v217_v24  ;;  %v226_v9 = vadd.f32 %v225_v47, %v224_v29  ;;  %v239_v54 = vrot.slane %v238_v63, 4  ;;  %v89_v24 = vld [vmem:[#allocation5 + $0x40] sm:$0x3]  ;;  %v90_v29 = vld [vmem:[#allocation5 + $0x42] sm:$0x3] }
  0x77   :  { %v213_v53 = vrot.slane %v212_v50, 2  ;;  %v246_v55 = vrot.slane %v245_v49, 4  ;;  %v252_v41 = vsel %vm153_vm0, %v119_v16, 0.0  ;;  %v233_v57 = vadd.f32 %v232_v51, %v231_v62  ;;  %v92_v47 = vld [vmem:[#allocation5 + $0x46] sm:$0x3] }
  0x78   :  { %v220_v12 = vrot.slane %v219_v8, 2  ;;  %v227_v34 = vrot.slane %v226_v9, 2  ;;  %v253_v13 = vrot.slane %v252_v41, 4  ;;  %v240_v56 = vadd.f32 %v239_v54, %v238_v63  ;;  %v93_v63 = vld [vmem:[#allocation5 + $0x48] sm:$0x3] }
  0x79   :  { %v214_v58 = vadd.f32 %v213_v53, %v212_v50  ;;  %v247_v22 = vadd.f32 %v246_v55, %v245_v49  ;;  %v259_v14 = vsel %vm153_vm0, %v120_v40, 0.0  ;;  %v234_v25 = vrot.slane %v233_v57, 2  ;;  %v94_v49 = vld [vmem:[#allocation5 + $0x4a] sm:$0x3]  ;;  %v96_v51 = vld [vmem:[#allocation5 + $0x4e] sm:$0x3] }
  0x7a   :  { %v221_v36 = vadd.f32 %v220_v12, %v219_v8  ;;  %v228_v59 = vadd.f32 %v227_v34, %v226_v9  ;;  %v254_v32 = vadd.f32 %v253_v13, %v252_v41  ;;  %v241_v61 = vrot.slane %v240_v56, 2  ;;  %v95_v9 = vld [vmem:[#allocation5 + $0x4c] sm:$0x3]  ;;  %v1321_v12 = vld [vmem:[#allocation5 + $0x52] sm:$0x3] }
  0x7b   :  { %v215_v60 = vrot.slane %v214_v58, 1  ;;  %v248_v42 = vrot.slane %v247_v22, 2  ;;  %v260_v44 = vrot.slane %v259_v14, 4  ;;  %v235_v48 = vadd.f32 %v234_v25, %v233_v57  ;;  %v1323_v34 = vld [vmem:[#allocation5 + $0x54] sm:$0x3] }
  0x7c   :  { %v222_v16 = vrot.slane %v221_v36, 1  ;;  %v229_v26 = vrot.slane %v228_v59, 1  ;;  %v255_v37 = vrot.slane %v254_v32, 2  ;;  %v242_v28 = vadd.f32 %v241_v61, %v240_v56  ;;  %v1325_v57 = vld [vmem:[#allocation5 + $0x56] sm:$0x3] }
  0x7d   :  { %v216_v27 = vadd.f32 %v215_v60, %v214_v58  ;;  %v249_v39 = vadd.f32 %v248_v42, %v247_v22  ;;  %v261_v0 = vadd.f32 %v260_v44, %v259_v14  ;;  %v236_v33 = vrot.slane %v235_v48, 1  ;;  %v1328_v58 = vld [vmem:[#allocation5 + $0x58] sm:$0x3]  ;;  %v1330_v56 = vld [vmem:[#allocation5 + $0x5a] sm:$0x3] }
  0x7e   :  { %v223_v1 = vadd.f32 %v222_v16, %v221_v36  ;;  %v230_v43 = vadd.f32 %v229_v26, %v228_v59  ;;  %v256_v40 = vadd.f32 %v255_v37, %v254_v32  ;;  %v243_v52 = vrot.slane %v242_v28, 1  ;;  %v973_v59 = vld [vmem:[#allocation2] sm:$0xff]  }
  0x7f   :  { %v250_v2 = vrot.slane %v249_v39, 1  ;;  %v262_v3 = vrot.slane %v261_v0, 2  ;;  %v551_v35 = vsel %vm550_vm1, %v167_v10, %v1265_v4  ;;  %v237_v5 = vadd.f32 %v236_v33, %v235_v48  ;;  %v91_v10 = vld [vmem:[#allocation5 + $0x44] sm:$0x3] }
  0x80   :  { %v257_v6 = vrot.slane %v256_v40, 1  ;;  %v553_v38 = vsel %vm552_vm2, %v174_v11, %v551_v35  ;;  %v564_v17 = vsel %vm550_vm1, %v223_v1, %v216_v27  ;;  %v244_v18 = vadd.f32 %v243_v52, %v242_v28 }
  0x81   :  { %v251_v19 = vadd.f32 %v250_v2, %v249_v39  ;;  %v263_v20 = vadd.f32 %v262_v3, %v261_v0  ;;  %v555_v23 = vsel %vm554_vm3, %v1267_v15, %v553_v38  ;;  %v565_v4 = vsel %vm552_vm2, %v230_v43, %v564_v17 }
  0x82   :  { %v258_v31 = vadd.f32 %v257_v6, %v256_v40  ;;  %v557_v46 = vsel %vm556_vm4, %v1269_v45, %v555_v23  ;;  %v566_v62 = vsel %vm554_vm3, %v237_v5, %v565_v4  ;;  %v1316_v45 = vld [vmem:[#allocation5 + $0x50] sm:$0x3]  ;;  %v137_v53 = vunpack.c.l.bf16 %v89_v24 }
  0x83   :  { %v264_v50 = vrot.slane %v263_v20, 1  ;;  %v559_v11 = vsel %vm558_vm5, %v1274_v21, %v557_v46  ;;  %v567_v8 = vsel %vm556_vm4, %v244_v18, %v566_v62  ;;  %v138_v54 = vunpack.c.l.bf16 %v90_v29  ;;  %v103_v62 = vld [vmem:[#allocation5 + $0x5c] sm:$0x3] }
  0x84   :  { %v561_v15 = vsel %vm560_vm6, %v1282_v30, %v559_v11  ;;  %v568_v21 = vsel %vm558_vm5, %v251_v19, %v567_v8  ;;  %v139_v30 = vunpack.c.l.bf16 %v91_v10  ;;  %v140_v22 = vunpack.c.l.bf16 %v92_v47 }
  0x85   :  { %v265_v55 = vadd.f32 %v264_v50, %v263_v20  ;;  %v563_v41 = vsel %vm562_vm7, %v1293_v7, %v561_v15  ;;  %v569_v13 = vsel %vm560_vm6, %v258_v31, %v568_v21  ;;  %v141_v14 = vunpack.c.l.bf16 %v93_v63  ;;  %v104_v63 = vld [vmem:[#allocation5 + $0x5e] sm:$0x3] }
  0x86   :  { %v142_v36 = vunpack.c.l.bf16 %v94_v49  ;;  %v143_v25 = vunpack.c.l.bf16 %v95_v9  ;;  %v144_v32 = vunpack.c.l.bf16 %v96_v51  ;;  %v145_v60 = vunpack.c.l.bf16 %v1316_v45 }
  0x87   :  { %v570_v7 = vsel %vm562_vm7, %v265_v55, %v569_v13  ;;  %v146_v42 = vunpack.c.l.bf16 %v1321_v12  ;;  %v147_v44 = vunpack.c.l.bf16 %v1323_v34  ;;  %v148_v16 = vunpack.c.l.bf16 %v1325_v57 }
  0x88   :  { %v606_v61 = vpack.c.bf16 %v570_v7, %v563_v41  ;;  %v149_v26 = vunpack.c.l.bf16 %v1328_v58  ;;  %v150_v48 = vunpack.c.l.bf16 %v1330_v56  ;;  %v378_v37 = vsel %vm153_vm0, %v137_v53, 0.0 }
  0x89   :  { %v385_v27 = vsel %vm153_vm0, %v138_v54, 0.0  ;;  %v379_v28 = vrot.slane %v378_v37, 4  ;;  %v392_v0 = vsel %vm153_vm0, %v139_v30, 0.0  ;;  %v399_v1 = vsel %vm153_vm0, %v140_v22, 0.0 }
  0x8a   :  { %771 = vmatprep.mubr.bf16.mxu0 %v606_v61  ;;  %v386_v39 = vrot.slane %v385_v27, 4  ;;  %v393_v43 = vrot.slane %v392_v0, 4  ;;  %v400_v33 = vrot.slane %v399_v1, 4  ;;  %v406_v40 = vsel %vm153_vm0, %v141_v14, 0.0 }
  0x8b   :  { %772 = vmatmul.mubr.bf16.vlgmr.msra.gmra.mrb[0].mxu0 %v973_v59  ;;  %v413_v52 = vsel %vm153_vm0, %v142_v36, 0.0  ;;  %v380_v2 = vadd.f32 %v379_v28, %v378_v37  ;;  %v407_v35 = vrot.slane %v406_v40, 4  ;;  %v420_v17 = vsel %vm153_vm0, %v143_v25, 0.0 }
  0x8c   :  { %v387_v3 = vadd.f32 %v386_v39, %v385_v27  ;;  %v414_v5 = vrot.slane %v413_v52, 4  ;;  %v394_v6 = vadd.f32 %v393_v43, %v392_v0  ;;  %v401_v38 = vadd.f32 %v400_v33, %v399_v1 }
  0x8d   :  { %v427_v18 = vsel %vm153_vm0, %v144_v32, 0.0  ;;  %v381_v19 = vrot.slane %v380_v2, 2  ;;  %v408_v23 = vadd.f32 %v407_v35, %v406_v40  ;;  %v421_v46 = vrot.slane %v420_v17, 4 }
  0x8e   :  { %v388_v20 = vrot.slane %v387_v3, 2  ;;  %v415_v24 = vadd.f32 %v414_v5, %v413_v52  ;;  %v395_v29 = vrot.slane %v394_v6, 2  ;;  %v402_v31 = vrot.slane %v401_v38, 2 }
  0x8f   :  { %v428_v4 = vrot.slane %v427_v18, 4  ;;  %v382_v10 = vadd.f32 %v381_v19, %v380_v2  ;;  %v409_v50 = vrot.slane %v408_v23, 2  ;;  %v422_v8 = vadd.f32 %v421_v46, %v420_v17 }
  0x90   :  { %v389_v47 = vadd.f32 %v388_v20, %v387_v3  ;;  %v416_v11 = vrot.slane %v415_v24, 2  ;;  %v396_v49 = vadd.f32 %v395_v29, %v394_v6  ;;  %v403_v15 = vadd.f32 %v402_v31, %v401_v38 }
  0x91   :  { %v429_v9 = vadd.f32 %v428_v4, %v427_v18  ;;  %v383_v51 = vrot.slane %v382_v10, 1  ;;  %v410_v54 = vadd.f32 %v409_v50, %v408_v23  ;;  %v423_v12 = vrot.slane %v422_v8, 2 }
  0x92   :  { %v390_v53 = vrot.slane %v389_v47, 1  ;;  %v417_v55 = vadd.f32 %v416_v11, %v415_v24  ;;  %v397_v41 = vrot.slane %v396_v49, 1  ;;  %v404_v21 = vrot.slane %v403_v15, 1 }
  0x93   :  { %v430_v30 = vrot.slane %v429_v9, 2  ;;  %v151_v13 = vunpack.c.l.bf16 %v103_v62  ;;  %v152_v22 = vunpack.c.l.bf16 %v104_v63  ;;  %v411_v14 = vrot.slane %v410_v54, 1 }
  0x94   :  { %v418_v36 = vrot.slane %v417_v55, 1  ;;  %v384_v7 = vadd.f32 %v383_v51, %v382_v10  ;;  %v391_v59 = vadd.f32 %v390_v53, %v389_v47  ;;  %v424_v25 = vadd.f32 %v423_v12, %v422_v8 }
  0x95   :  { %v1347_v32 = vadd.f32 %v430_v30, %v429_v9  ;;  %v1349_v61 = vadd.f32 %v397_v41, %v396_v49  ;;  %v1351_v37 = vadd.f32 %v404_v21, %v403_v15  ;;  %v434_v27 = vsel %vm153_vm0, %v145_v60, 0.0 }
  0x96   :  { %v441_v28 = vsel %vm153_vm0, %v146_v42, 0.0  ;;  %v1357_v39 = vadd.f32 %v411_v14, %v410_v54  ;;  %v1359_v0 = vadd.f32 %v418_v36, %v417_v55  ;;  %v435_v1 = vrot.slane %v434_v27, 4 }
  0x97   :  { %v442_v43 = vrot.slane %v441_v28, 4  ;;  %v448_v33 = vsel %vm153_vm0, %v147_v44, 0.0  ;;  %v455_v40 = vsel %vm153_vm0, %v148_v16, 0.0  ;;  %v462_v45 = vsel %vm153_vm0, %v149_v26, 0.0 }
  0x98   :  { %v469_v60 = vsel %vm153_vm0, %v150_v48, 0.0  ;;  %v425_v42 = vrot.slane %v424_v25, 1  ;;  %v432_v52 = vrot.slane %v1347_v32, 1  ;;  %v436_v2 = vadd.f32 %v435_v1, %v434_v27 }
  0x99   :  { %v443_v3 = vadd.f32 %v442_v43, %v441_v28  ;;  %v449_v34 = vrot.slane %v448_v33, 4  ;;  %v456_v35 = vrot.slane %v455_v40, 4  ;;  %v463_v44 = vrot.slane %v462_v45, 4 }
  0x9a   :  { %v470_v5 = vrot.slane %v469_v60, 4  ;;  %v437_v57 = vrot.slane %v436_v2, 2  ;;  %v476_v16 = vsel %vm153_vm0, %v151_v13, 0.0  ;;  %v483_v58 = vsel %vm153_vm0, %v152_v22, 0.0 }
  0x9b   :  { %v444_v6 = vrot.slane %v443_v3, 2  ;;  %v450_v26 = vadd.f32 %v449_v34, %v448_v33  ;;  %v457_v38 = vadd.f32 %v456_v35, %v455_v40  ;;  %v464_v56 = vadd.f32 %v463_v44, %v462_v45  ;;  %v974_v34 = vld [vmem:[#allocation2 + $0x10] sm:$0xff]  }
  0x9c   :  { %v471_v17 = vadd.f32 %v470_v5, %v469_v60  ;;  %v438_v48 = vadd.f32 %v437_v57, %v436_v2  ;;  %v477_v19 = vrot.slane %v476_v16, 4  ;;  %v484_v20 = vrot.slane %v483_v58, 4 }
  0x9d   :  { %v445_v18 = vadd.f32 %v444_v6, %v443_v3  ;;  %v451_v23 = vrot.slane %v450_v26, 2  ;;  %v458_v24 = vrot.slane %v457_v38, 2  ;;  %v465_v29 = vrot.slane %v464_v56, 2 }
  0x9e   :  { %v472_v31 = vrot.slane %v471_v17, 2  ;;  %v439_v46 = vrot.slane %v438_v48, 1  ;;  %v478_v10 = vadd.f32 %v477_v19, %v476_v16  ;;  %v485_v47 = vadd.f32 %v484_v20, %v483_v58 }
  0x9f   :  { %v446_v4 = vrot.slane %v445_v18, 1  ;;  %v452_v50 = vadd.f32 %v451_v23, %v450_v26  ;;  %v459_v11 = vadd.f32 %v458_v24, %v457_v38  ;;  %v466_v62 = vadd.f32 %v465_v29, %v464_v56 }
  0xa0   :  { %v473_v63 = vadd.f32 %v472_v31, %v471_v17  ;;  %v440_v49 = vadd.f32 %v439_v46, %v438_v48  ;;  %v479_v8 = vrot.slane %v478_v10, 2  ;;  %v486_v9 = vrot.slane %v485_v47, 2 }
  0xa1   :  { %v447_v15 = vadd.f32 %v446_v4, %v445_v18  ;;  %v453_v51 = vrot.slane %v452_v50, 1  ;;  %v460_v53 = vrot.slane %v459_v11, 1  ;;  %v467_v54 = vrot.slane %v466_v62, 1 }
  0xa2   :  { %v474_v55 = vrot.slane %v473_v63, 1  ;;  %v480_v41 = vadd.f32 %v479_v8, %v478_v10  ;;  %v487_v21 = vadd.f32 %v486_v9, %v485_v47  ;;  %v585_v12 = vsel %vm550_vm1, %v391_v59, %v384_v7 }
  0xa3   :  { %v592_v30 = vsel %vm550_vm1, %v447_v15, %v440_v49  ;;  %v426_v13 = vadd.f32 %v425_v42, %v424_v25  ;;  %v454_v22 = vadd.f32 %v453_v51, %v452_v50  ;;  %v461_v14 = vadd.f32 %v460_v53, %v459_v11 }
  0xa4   :  { %v468_v36 = vadd.f32 %v467_v54, %v466_v62  ;;  %v475_v27 = vadd.f32 %v474_v55, %v473_v63  ;;  %v481_v28 = vrot.slane %v480_v41, 1  ;;  %v488_v1 = vrot.slane %v487_v21, 1 }
  0xa5   :  { %v586_v43 = vsel %vm552_vm2, %v1349_v61, %v585_v12  ;;  %v433_v33 = vadd.f32 %v432_v52, %v1347_v32  ;;  %v593_v45 = vsel %vm552_vm2, %v454_v22, %v592_v30 }
  0xa6   :  { %v587_v40 = vsel %vm554_vm3, %v1351_v37, %v586_v43  ;;  %v482_v7 = vadd.f32 %v481_v28, %v480_v41  ;;  %v489_v59 = vadd.f32 %v488_v1, %v487_v21  ;;  %v594_v60 = vsel %vm554_vm3, %v461_v14, %v593_v45 }
  0xa7   :  { %v588_v25 = vsel %vm556_vm4, %v1357_v39, %v587_v40  ;;  %v595_v2 = vsel %vm556_vm4, %v468_v36, %v594_v60 }
  0xa8   :  { %v589_v42 = vsel %vm558_vm5, %v1359_v0, %v588_v25  ;;  %v596_v32 = vsel %vm558_vm5, %v475_v27, %v595_v2 }
  0xa9   :  { %v590_v61 = vsel %vm560_vm6, %v426_v13, %v589_v42  ;;  %v597_v52 = vsel %vm560_vm6, %v482_v7, %v596_v32 }
  0xaa   :  { %v591_v37 = vsel %vm562_vm7, %v433_v33, %v590_v61  ;;  %v598_v3 = vsel %vm562_vm7, %v489_v59, %v597_v52 }
  0xab   :  { %v610_v35 = vpack.c.bf16 %v598_v3, %v591_v37 }
  0xad   :  { %787 = vmatprep.mubr.bf16.mxu1 %v610_v35 }
  0xae   :  { %788 = vmatmul.mubr.bf16.gmra.mrb[4].mxu1 %v974_v34 }
 0x13b   :  { %v920_v39 = vpop.f32.mrb[0].mxu1 }
 0x13c   :  { %v921_v44 = vpop.f32.mrb[1].mxu1 }
 0x13d   :  { %v922_v5 = vadd.f32 %v921_v44, %v920_v39  ;;  %v923_v0 = vpop.f32.mrb[2].mxu1 }
 0x13e   :  { %v924_v57 = vpop.f32.mrb[3].mxu1 }
 0x13f   :  { %v925_v6 = vadd.f32 %v924_v57, %v923_v0  ;;  %v798_v16 = vmax.f32 %v922_v5, 0.0 }
 0x141   :  { %v799_v58 = vmax.f32 %v925_v6, 0.0 }
 0x143   :  { %v889_v26 = vpack.c.bf16 %v799_v58, %v798_v16 }
 0x145   :  { %896 = vst [vmem:[#allocation8 + $0x8] sm:$0xff] %v889_v26  }
 0x15e   :  { %v914_v38 = vpop.f32.mrb[0].mxu0 }
 0x15f   :  { %v915_v56 = vpop.f32.mrb[1].mxu0 }
 0x160   :  { %v916_v17 = vadd.f32 %v915_v56, %v914_v38  ;;  %v917_v48 = vpop.f32.mrb[2].mxu0 }
 0x161   :  { %v918_v18 = vpop.f32.mrb[3].mxu0 }
 0x162   :  { %v796_v19 = vmax.f32 %v916_v17, 0.0  ;;  %v919_v20 = vadd.f32 %v918_v18, %v917_v48 }
 0x164   :  { %v797_v23 = vmax.f32 %v919_v20, 0.0 }
 0x166   :  { %v884_v24 = vpack.c.bf16 %v797_v23, %v796_v19 }
 0x168   :  { %885 = vst [vmem:[#allocation8] sm:$0xff] %v884_v24  }
 0x181   :  { %v926_v29 = vpop.f32.mrb[4].mxu1 }
 0x182   :  { %v927_v31 = vpop.f32.mrb[5].mxu1 }
 0x183   :  { %v928_v46 = vadd.f32 %v927_v31, %v926_v29  ;;  %v929_v4 = vpop.f32.mrb[6].mxu1 }
 0x184   :  { %v930_v10 = vpop.f32.mrb[7].mxu1 }
 0x185   :  { %v931_v47 = vadd.f32 %v930_v10, %v929_v4  ;;  %v800_v50 = vmax.f32 %v928_v46, 0.0 }
 0x187   :  { %v801_v11 = vmax.f32 %v931_v47, 0.0 }
 0x189   :  { %v894_v62 = vpack.c.bf16 %v801_v11, %v800_v50 }
 0x18b   :  { %897 = vst [vmem:[#allocation8 + $0x10] sm:$0xff] %v894_v62  }
 0x18c   :  { %1052 = shalt.err (!%p1049_p0)
}
 0x18d   :  { %s1053_s27 = scalar_lea.hbm %s1413_s3, 384 }
 0x18e   :  { %p1054_p1 = scmp.ne.s32.totalorder %s1413_s3, %s1053_s27  ;;  %p1057_p2 = scmp.lt.u32.totalorder %s1053_s27, %s1413_s3 }
 0x190   :  { %p1059_p3 = pnand %p1057_p2, %p1054_p1 }
 0x192   :  { %1062 = shalt.err (!%p1059_p3)
}
 0x193   :  { %843 = dma.vmem_to_hbm [thread:$0]  %s838_s23, 384, %s1413_s3, [#allocation4], %s1073_s1, %s1073_s1, %s1074_s9  }
 0x194   :  { %1067 = dma.done.wait [#allocation4], 384  }
 0x195   :  { %1068 = vsyncadd [#allocation4], 4294966912 }
 0x196   :  { %847 = vsyncpa [#allocation3], 1 }
 0x197   :  { %848 = vsyncpa [#allocation6], 1 }
 0x198   :  { %849 = vsyncpa [#allocation4], 1 }

</bundles_post_ra>
